<compile_context>
chip_gen: v7x
topology: tpu7x:2x2x1
jax: 0.10.0
libtpu: 0.0.40
codegen_flags: <defaults>
</compile_context>

<pallas_src>
import functools

import jax
import jax.numpy as jnp
from jax import lax
from jax.experimental import pallas as pl
from jax.experimental.pallas import tpu as pltpu


def _round_up(x, m):
    return ((x + m - 1) // m) * m


def _choose_tiles(n_rows, hw, bytes_per_elem=4, target_bytes=2 << 20):
    """Lane-dense tiles: rows multiple of 8, HW lane tile multiple of 128,
    ~2 MiB per x block.  Double-buffered in+out blocks stay well under the
    scoped-VMEM defaults on v5e (16 MiB) and v6e/v7x (32 MiB)."""
    tile_hw = min(_round_up(hw, 128), 4096)
    target_rows = max(8, target_bytes // (tile_hw * max(1, bytes_per_elem)))
    tile_r = min(_round_up(n_rows, 8), _round_up(target_rows, 8))
    return int(tile_r), int(tile_hw)


# ------------- kernel 1: tiled spatial reduction -> per-row mean -------------
def _row_mean_kernel(x_ref, o_ref, acc_ref, *, inv_hw, hw, tile_hw, mask_cols):
    # x_ref: (TILE_R, TILE_HW)   o_ref / acc_ref: (TILE_R, 1)
    c = pl.program_id(1)

    @pl.when(c == 0)
    def _():
        acc_ref[...] = jnp.zeros_like(acc_ref)

    xv = x_ref[...].astype(jnp.float32)
    if mask_cols:  # static: only emitted when HW % tile_hw != 0
        col = c * tile_hw + lax.broadcasted_iota(jnp.int32, xv.shape, 1)
        xv = jnp.where(col < hw, xv, 0.0)
    acc_ref[...] += jnp.sum(xv, axis=-1, keepdims=True)

    @pl.when(c == pl.num_programs(1) - 1)
    def _():
        o_ref[...] = acc_ref[...] * inv_hw


def _row_means(x_rows, tile_r, tile_hw):
    R, HW = x_rows.shape
    kernel = functools.partial(
        _row_mean_kernel,
        inv_hw=1.0 / float(HW),
        hw=HW,
        tile_hw=tile_hw,
        mask_cols=(HW % tile_hw) != 0,
    )
    return pl.pallas_call(
        kernel,
        out_shape=jax.ShapeDtypeStruct((R, 1), jnp.float32),
        grid_spec=pltpu.PrefetchScalarGridSpec(
            num_scalar_prefetch=0,
            grid=(pl.cdiv(R, tile_r), pl.cdiv(HW, tile_hw)),
            in_specs=[pl.BlockSpec((tile_r, tile_hw), lambda r, c: (r, c))],
            out_specs=pl.BlockSpec((tile_r, 1), lambda r, c: (r, 0)),
            scratch_shapes=[pltpu.VMEM((tile_r, 1), jnp.float32)],
        ),
        compiler_params=pltpu.CompilerParams(
            dimension_semantics=("parallel", "arbitrary")
        ),
    )(x_rows)


# ------------- kernel 2: broadcast scale  out = x * scale_per_row ------------
def _scale_kernel(x_ref, s_ref, o_ref):
    # x_ref: (TILE_R, TILE_HW)  s_ref: (TILE_R, 1) f32  o_ref: (TILE_R, TILE_HW)
    o_ref[...] = (x_ref[...].astype(jnp.float32) * s_ref[...]).astype(o_ref.dtype)


def _scale_rows(x_rows, scale_rows_f32, tile_r, tile_hw):
    R, HW = x_rows.shape
    return pl.pallas_call(
        _scale_kernel,
        out_shape=jax.ShapeDtypeStruct((R, HW), x_rows.dtype),
        grid_spec=pltpu.PrefetchScalarGridSpec(
            num_scalar_prefetch=0,
            grid=(pl.cdiv(R, tile_r), pl.cdiv(HW, tile_hw)),
            in_specs=[
                pl.BlockSpec((tile_r, tile_hw), lambda r, c: (r, c)),
                pl.BlockSpec((tile_r, 1), lambda r, c: (r, 0)),
            ],
            out_specs=pl.BlockSpec((tile_r, tile_hw), lambda r, c: (r, c)),
        ),
        compiler_params=pltpu.CompilerParams(
            dimension_semantics=("parallel", "parallel")
        ),
    )(x_rows, scale_rows_f32)


def attention_forward(x_nchw, weight, bias):
    """x_nchw: (B, C_in, H, W); weight: (C_out, C_in, 1, 1); bias: (C_out,)."""
    B, C_in, H, W = x_nchw.shape
    C_out = weight.shape[0]
    assert C_out == C_in, "broadcast in `x * attention_map` requires C_out == C_in"
    HW = H * W
    R = B * C_in

    tile_r, tile_hw = _choose_tiles(R, HW, bytes_per_elem=x_nchw.dtype.itemsize)

    # Fold (B, C) into the sublane axis; keep H*W lane-dense.  Contiguous view.
    x_rows = x_nchw.reshape(R, HW)

    # 1) per-(b,c) spatial mean via tiled Pallas reduction.
    means = _row_means(x_rows, tile_r, tile_hw)                   # (R, 1) f32
    means_bc = means[:, 0].reshape(B, C_in)

    # 2) tiny 1x1 conv (channel matmul) + bias + softmax(dim=-1) in plain JAX.
    #    Faithful to PyTorch: softmax over the trailing size-1 spatial axis.
    w2d = weight.reshape(C_out, C_in).astype(jnp.float32)
    logits = means_bc @ w2d.T + bias.astype(jnp.float32)          # (B, C_out)
    attn = jax.nn.softmax(logits[:, :, None, None], axis=-1)      # size-1 axis -> 1.0
    scale_rows = attn[:, :, 0, 0].reshape(R, 1).astype(jnp.float32)

    # 3) HBM-roofline broadcast scale pass.
    out_rows = _scale_rows(x_rows, scale_rows, tile_r, tile_hw)
    return out_rows.reshape(B, C_in, H, W)


def attention_reference(x_nchw, weight, bias):
    """Pure-JAX reference mirroring the PyTorch module."""
    gf = jnp.mean(x_nchw, axis=(2, 3), keepdims=True)             # (B, C, 1, 1)
    w2d = weight.reshape(weight.shape[0], weight.shape[1])
    attn = jnp.einsum("bcij,oc->boij", gf, w2d) + bias[None, :, None, None]
    attn = jax.nn.softmax(attn, axis=-1)                          # size-1 axis
    return x_nchw * attn


if __name__ == "__main__":
    B, C, H, W = 2, 4, 16, 16  # in_channels == out_channels == 4

    key = jax.random.PRNGKey(0)
    kx, kw, kb = jax.random.split(key, 3)
    x = jax.random.normal(kx, (B, C, H, W), dtype=jnp.float32)
    # Deterministic Conv2d(C, C, kernel_size=1) parameters.
    weight = jax.random.normal(kw, (C, C, 1, 1), dtype=jnp.float32) * 0.1
    bias = jax.random.normal(kb, (C,), dtype=jnp.float32) * 0.1

    out = attention_forward(x, weight, bias)
    out = jax.block_until_ready(out)

    ref = attention_reference(x, weight, bias)
    assert out.shape == (B, C, H, W)
    assert jnp.allclose(out, ref, atol=1e-5, rtol=1e-5), "mismatch vs reference"

    print("KERNEL_OK")
</pallas_src>

<mosaic_0001>
module attributes {stable_mosaic.version = 11 : i64} {
  func.func @_row_mean_kernel(%arg0: i32, %arg1: i32, %arg2: memref<8x256xf32, #tpu.memory_space<vmem>>, %arg3: memref<8x1xf32, #tpu.memory_space<vmem>>, %arg4: memref<8x1xf32, #tpu.memory_space<vmem>>) attributes {dimension_semantics = [#tpu.dimension_semantics<parallel>, #tpu.dimension_semantics<arbitrary>], iteration_bounds = array<i64: 1, 1>, scalar_prefetch = 0 : i64, scratch_operands = 1 : i64, tpu.core_type = #tpu.core_type<tc>, window_params = [{transform_indices = @transform_0, window_bounds = array<i64: 8, 256>}, {transform_indices = @transform_1, window_bounds = array<i64: 8, 1>}]} {
    %c0_i32 = arith.constant 0 : i32
    %0 = arith.cmpi eq, %arg1, %c0_i32 : i32
    %1 = arith.extui %0 : i1 to i32
    %c0_i32_0 = arith.constant 0 : i32
    %2 = arith.cmpi ne, %1, %c0_i32_0 : i32
    scf.if %2 {
      %cst_8 = arith.constant 0.000000e+00 : f32
      %12 = vector.broadcast %cst_8 : f32 to vector<8x1xf32>
      %c0_9 = arith.constant 0 : index
      %c0_10 = arith.constant 0 : index
      %13 = vector.load %arg4[%c0_9, %c0_10] : memref<8x1xf32, #tpu.memory_space<vmem>>, vector<8x1xf32>
      tpu.vector_store %arg4[%c0_9, %c0_10], %12 {strides = array<i32>} : memref<8x1xf32, #tpu.memory_space<vmem>>, vector<8x1xf32>,
    } else {
    }
    %c0 = arith.constant 0 : index
    %c0_1 = arith.constant 0 : index
    %3 = vector.load %arg2[%c0, %c0_1] : memref<8x256xf32, #tpu.memory_space<vmem>>, vector<8x256xf32>
    %c0_2 = arith.constant 0 : index
    %c0_3 = arith.constant 0 : index
    %4 = vector.load %arg4[%c0_2, %c0_3] : memref<8x1xf32, #tpu.memory_space<vmem>>, vector<8x1xf32>
    %cst = arith.constant dense<0.000000e+00> : vector<8xf32>
    %5 = vector.multi_reduction <add>, %3, %cst [1] : vector<8x256xf32> to vector<8xf32>
    %6 = vector.shape_cast %5 : vector<8xf32> to vector<8x1xf32>
    %7 = arith.addf %4, %6 : vector<8x1xf32>
    %c0_4 = arith.constant 0 : index
    %c0_5 = arith.constant 0 : index
    %8 = vector.load %arg4[%c0_4, %c0_5] : memref<8x1xf32, #tpu.memory_space<vmem>>, vector<8x1xf32>
    tpu.vector_store %arg4[%c0_4, %c0_5], %7 {strides = array<i32>} : memref<8x1xf32, #tpu.memory_space<vmem>>, vector<8x1xf32>,
    %c0_i32_6 = arith.constant 0 : i32
    %9 = arith.cmpi eq, %arg1, %c0_i32_6 : i32
    %10 = arith.extui %9 : i1 to i32
    %c0_i32_7 = arith.constant 0 : i32
    %11 = arith.cmpi ne, %10, %c0_i32_7 : i32
    scf.if %11 {
      %c0_8 = arith.constant 0 : index
      %c0_9 = arith.constant 0 : index
      %12 = vector.load %arg4[%c0_8, %c0_9] : memref<8x1xf32, #tpu.memory_space<vmem>>, vector<8x1xf32>
      %cst_10 = arith.constant 3.906250e-03 : f32
      %13 = vector.broadcast %cst_10 : f32 to vector<8x1xf32>
      %14 = arith.mulf %12, %13 : vector<8x1xf32>
      %c0_11 = arith.constant 0 : index
      %c0_12 = arith.constant 0 : index
      %15 = vector.load %arg3[%c0_11, %c0_12] : memref<8x1xf32, #tpu.memory_space<vmem>>, vector<8x1xf32>
      tpu.vector_store %arg3[%c0_11, %c0_12], %14 {strides = array<i32>} : memref<8x1xf32, #tpu.memory_space<vmem>>, vector<8x1xf32>,
    } else {
    }
    return
  }
  func.func @transform_0(%arg0: i32, %arg1: i32) -> (i32, i32) {
    %c0_i32 = arith.constant 0 : i32
    return %arg0, %arg1 : i32, i32
  }
  func.func @transform_1(%arg0: i32, %arg1: i32) -> (i32, i32) {
    %c0_i32 = arith.constant 0 : i32
    %c0_i32_0 = arith.constant 0 : i32
    return %arg0, %c0_i32 : i32, i32
  }
}

</mosaic_0001>

<bundles_post_ra>
// kernel: tpu_custom_call.1
= control target key start
LH: loop header
LB: loop body
LE: loop exit
PB: predicated region body
PF: predicated region fallthrough
CT: control target
= control target key end

     0   :  { %6 = vsyncpa [#allocation4], 0  ;;  %s72_s6 = smov [#allocation3]   ;;  %s99_s0 = inlined_call_operand.hbm [shape: f32[8,256], index: 0, kind: input, shape index: {}]   ;;  %s100_s1 = inlined_call_operand.vmem [shape: f32[8,1], index: 1, kind: output, shape index: {}]  }
   0x1   :  { %s13_s7 = sshll.u32 %s72_s6, 4  ;;  %s48_s10 = scalar_lea.hbm %s99_s0, 256  ;;  %s14_s7 = int_to_ptr.vmem [resolvable:$true] %s13_s7 }
   0x2   :  { %p49_p0 = scmp.ne.s32.totalorder %s99_s0, %s48_s10  ;;  %p52_p1 = scmp.lt.u32.totalorder %s48_s10, %s99_s0 }
   0x4   :  { %p54_p2 = pnand %p52_p1, %p49_p0 }
   0x6   :  { %57 = shalt.err (!%p54_p2)
}
   0x7   :  { %s58_s15 = scalar_lea.vmem %s14_s7, 256  ;;  %p63_p4 = scmp.lt.s32.totalorder %s14_s7, %s14_s7 }
   0x8   :  { %p59_p3 = scmp.ne.s32.totalorder %s14_s7, %s58_s15  ;;  %p64_p5 = scmp.lt.s32.totalorder %s58_s15, %s58_s15 }
   0xa   :  { %p65_p6 = por %p64_p5, %p63_p4 }
   0xc   :  { %p66_p7 = pnand %p65_p6, %p59_p3 }
   0xe   :  { %69 = shalt.err (!%p66_p7)
}
   0xf   :  { %16 = dma.hbm_to_vmem [thread:$0]  %s99_s0, 256, %s14_s7, [#allocation4]  }
  0x10   :  { %70 = dma.done.wait [#allocation4], 256  }
  0x11   :  { %71 = vsyncadd [#allocation4], 4294967040  ;;  %vm24_vm0 = vcmask 7168   ;;  %v73_v0 = vmov 0.0   ;;  %v26_v1 = vld [vmem:[#allocation3] sm:$0xff]  ;;  %v27_v2 = vld [vmem:[#allocation3 + $0x8] sm:$0xff] }
  0x12   :  { %25 = vst.msk [vmem:[#allocation2] sm:$0xff] %vm24_vm0, %v73_v0  ;;  %v29_v3 = vadd.f32 %v27_v2, %v26_v1 }
  0x14   :  { %30 = vadd.xlane.f32.xlu0 %v29_v3 }
  0x19   :  { %v28_v4 = vld [vmem:[#allocation2] sm:$0xff] }
  0xa1   :  { %v31_v5 = vpop.xlane.xlu0 %30 }
  0xa2   :  { %v32_v6 = vadd.f32 %v31_v5, %v28_v4 }
  0xa4   :  { %34 = vst.msk [vmem:[#allocation2] sm:$0xff] %vm24_vm0, %v32_v6 }
  0xab   :  { %v38_v7 = vld [vmem:[#allocation2] sm:$0xff] }
  0xac   :  { %v39_v8 = vmul.f32 0.00390625, %v38_v7 }
  0xae   :  { %40 = vst.msk [vmem:[%s100_s1] sm:$0xff] %vm24_vm0, %v39_v8 }
  0xaf   :  { %45 = vsyncpa [#allocation4], 1 }

</bundles_post_ra>
